<compile_context>
chip_gen: v6e
topology: v6e:2x2x1
jax: 0.10.0
libtpu: 0.0.40
codegen_flags: <defaults>
</compile_context>

<pallas_src>
import jax
import jax.numpy as jnp
from jax.experimental import pallas as pl
from jax.experimental.pallas import tpu as pltpu


def _affine_kernel(a_ref, b_ref, x_ref, o_ref):
    # a_ref / b_ref are (1, 1) f32 scalars in SMEM:  y = x * a + b.
    a = a_ref[0, 0]
    b = b_ref[0, 0]
    x = x_ref[...].astype(jnp.float32)
    o_ref[...] = (x * a + b).astype(o_ref.dtype)


def audio_normalize(x, mean, std, *, tile_rows=512, lane_cols=1024):
    """(x - mean) / std via a Pallas TPU kernel.

    Works for any input shape/dtype; math is done in f32, cast back on store.
    lane_cols must be a multiple of 128; tile_rows a multiple of 8.
    Default block = (512, 1024) f32 = 2 MiB (safe on v5e/v6e/v7x VMEM budgets).
    """
    assert lane_cols % 128 == 0 and tile_rows % 8 == 0

    orig_shape = x.shape
    orig_dtype = x.dtype
    n = x.size

    # Fused affine coefficients, always in f32 regardless of x dtype.
    # TODO(synk): no guard for std == 0 (matches the reference module).
    a = jnp.float32(1.0) / jnp.asarray(std, jnp.float32)
    b = -jnp.asarray(mean, jnp.float32) * a
    a_arr = a.reshape(1, 1)
    b_arr = b.reshape(1, 1)

    # --- Reshape to a lane-dense 2-D slab: (rows, lane_cols) -----------------
    flat = x.reshape(-1)
    rows = pl.cdiv(n, lane_cols)                      # ceil-div to full lanes
    rows = ((rows + 7) // 8) * 8                      # sublane multiple of 8
    t_rows = min(tile_rows, rows)                     # shrink row-tile for tiny inputs
    rows = pl.cdiv(rows, t_rows) * t_rows             # grid tiles evenly
    padded_n = rows * lane_cols
    if padded_n != n:
        flat = jnp.pad(flat, (0, padded_n - n))
    slab = flat.reshape(rows, lane_cols)

    grid = (rows // t_rows,)

    out = pl.pallas_call(
        _affine_kernel,
        out_shape=jax.ShapeDtypeStruct((rows, lane_cols), orig_dtype),
        grid=grid,
        in_specs=[
            pl.BlockSpec(memory_space=pltpu.MemorySpace.SMEM),   # a = 1/std
            pl.BlockSpec(memory_space=pltpu.MemorySpace.SMEM),   # b = -mean/std
            pl.BlockSpec((t_rows, lane_cols), lambda i: (i, 0)),
        ],
        out_specs=pl.BlockSpec((t_rows, lane_cols), lambda i: (i, 0)),
        compiler_params=pltpu.CompilerParams(
            dimension_semantics=("parallel",),
        ),
    )(a_arr, b_arr, slab)

    return out.reshape(-1)[:n].reshape(orig_shape)


if __name__ == "__main__":
    # Deterministic module parameters (AudioNormalize(mean, std)).
    mean = 0.25
    std = 0.5

    # Small audio-like input: batch=2, samples=1024.
    key = jax.random.PRNGKey(0)
    x = jax.random.normal(key, (2, 1024), dtype=jnp.float32)

    y = audio_normalize(x, mean, std)
    y = jax.block_until_ready(y)

    # Reference check in plain JAX (module semantics).
    y_ref = (x - mean) / std
    assert y.shape == x.shape and y.dtype == x.dtype
    assert jnp.allclose(y, y_ref, atol=1e-6, rtol=1e-5)

    print("KERNEL_OK")
</pallas_src>

<mosaic_0001>
module attributes {stable_mosaic.version = 11 : i64} {
  func.func @_affine_kernel(%arg0: i32, %arg1: memref<1x1xf32, #tpu.memory_space<smem>>, %arg2: memref<1x1xf32, #tpu.memory_space<smem>>, %arg3: memref<8x1024xf32, #tpu.memory_space<vmem>>, %arg4: memref<8x1024xf32, #tpu.memory_space<vmem>>) attributes {dimension_semantics = [#tpu.dimension_semantics<parallel>], iteration_bounds = array<i64: 1>, scalar_prefetch = 0 : i64, scratch_operands = 0 : i64, tpu.core_type = #tpu.core_type<tc>, window_params = [{transform_indices = @transform_0, window_bounds = array<i64: 1, 1>}, {transform_indices = @transform_1, window_bounds = array<i64: 1, 1>}, {transform_indices = @transform_2, window_bounds = array<i64: 8, 1024>}, {transform_indices = @transform_3, window_bounds = array<i64: 8, 1024>}]} {
    %c0 = arith.constant 0 : index
    %c0_0 = arith.constant 0 : index
    %0 = memref.load %arg1[%c0, %c0_0] : memref<1x1xf32, #tpu.memory_space<smem>>
    %c0_1 = arith.constant 0 : index
    %c0_2 = arith.constant 0 : index
    %1 = memref.load %arg2[%c0_1, %c0_2] : memref<1x1xf32, #tpu.memory_space<smem>>
    %c0_3 = arith.constant 0 : index
    %c0_4 = arith.constant 0 : index
    %2 = vector.load %arg3[%c0_3, %c0_4] : memref<8x1024xf32, #tpu.memory_space<vmem>>, vector<8x1024xf32>
    %3 = vector.broadcast %0 : f32 to vector<8x1024xf32>
    %4 = arith.mulf %2, %3 : vector<8x1024xf32>
    %5 = vector.broadcast %1 : f32 to vector<8x1024xf32>
    %6 = arith.addf %4, %5 : vector<8x1024xf32>
    %c0_5 = arith.constant 0 : index
    %c0_6 = arith.constant 0 : index
    %7 = vector.load %arg4[%c0_5, %c0_6] : memref<8x1024xf32, #tpu.memory_space<vmem>>, vector<8x1024xf32>
    tpu.vector_store %arg4[%c0_5, %c0_6], %6 {strides = array<i32>} : memref<8x1024xf32, #tpu.memory_space<vmem>>, vector<8x1024xf32>,
    return
  }
  func.func @transform_0(%arg0: i32) -> (i32, i32) {
    %c0_i32 = arith.constant 0 : i32
    %c0_i32_0 = arith.constant 0 : i32
    %c0_i32_1 = arith.constant 0 : i32
    return %c0_i32, %c0_i32_0 : i32, i32
  }
  func.func @transform_1(%arg0: i32) -> (i32, i32) {
    %c0_i32 = arith.constant 0 : i32
    %c0_i32_0 = arith.constant 0 : i32
    %c0_i32_1 = arith.constant 0 : i32
    return %c0_i32, %c0_i32_0 : i32, i32
  }
  func.func @transform_2(%arg0: i32) -> (i32, i32) {
    %c0_i32 = arith.constant 0 : i32
    %c0_i32_0 = arith.constant 0 : i32
    return %arg0, %c0_i32 : i32, i32
  }
  func.func @transform_3(%arg0: i32) -> (i32, i32) {
    %c0_i32 = arith.constant 0 : i32
    %c0_i32_0 = arith.constant 0 : i32
    return %arg0, %c0_i32 : i32, i32
  }
}

</mosaic_0001>

<bundles_post_ra>
// kernel: tpu_custom_call.1
= control target key start
LH: loop header
LB: loop body
LE: loop exit
PB: predicated region body
PF: predicated region fallthrough
CT: control target
= control target key end

     0   :  { %10 = vsyncpa [#allocation5], 0  ;;  %s160_s0 = inlined_call_operand.<no memory space> [shape: f32[1,1], index: 0, kind: input, shape index: {}]   ;;  %s161_s1 = inlined_call_operand.<no memory space> [shape: f32[1,1], index: 1, kind: input, shape index: {}]   ;;  %s162_s2 = inlined_call_operand.hbm [shape: f32[8,1024], index: 2, kind: input, shape index: {}]   ;;  %s163_s3 = inlined_call_operand.hbm [shape: f32[8,1024], index: 3, kind: output, shape index: {}]  }
   0x1   :  { %11 = vsyncpa [#allocation6], 0  ;;  %s126_s12 = smov [#allocation4]  }
   0x2   :  { %s22_s13 = sshll.u32 %s126_s12, 4  ;;  %s23_s13 = int_to_ptr.vmem [resolvable:$true] %s22_s13 }
   0x3   :  { %s90_s14 = scalar_lea.vmem %s23_s13, 1024  ;;  %p95_p1 = scmp.lt.s32.totalorder %s23_s13, %s23_s13 }
   0x4   :  { %p91_p0 = scmp.ne.s32.totalorder %s23_s13, %s90_s14  ;;  %p96_p2 = scmp.lt.s32.totalorder %s90_s14, %s90_s14 }
   0x6   :  { %p97_p3 = por %p96_p2, %p95_p1 }
   0x8   :  { %p98_p4 = pnand %p97_p3, %p91_p0 }
   0xa   :  { %101 = shalt.err (!%p98_p4)
}
   0xb   :  { %25 = dma.hbm_to_vmem [thread:$0]  %s162_s2, 1024, %s23_s13, [#allocation5]  }
   0xc   :  { %122 = dma.done.wait [#allocation5], 1024  }
   0xd   :  { %123 = vsyncadd [#allocation5], 4294966272  ;;  %v39_v0 = vstv %s160_s0  ;;  %v31_v1 = vld [vmem:[#allocation4] sm:$0xff]  ;;  %v48_v2 = vstv %s161_s1  ;;  %v32_v3 = vld [vmem:[#allocation4 + $0x8] sm:$0xff]  ;;  %s127_s0 = smov [#allocation7]  }
   0xe   :  { %v33_v4 = vld [vmem:[#allocation4 + $0x10] sm:$0xff]  ;;  %v40_v5 = vmul.f32 %v39_v0, %v31_v1  ;;  %v41_v6 = vmul.f32 %v39_v0, %v32_v3  ;;  %v34_v8 = vld [vmem:[#allocation4 + $0x18] sm:$0xff]  ;;  %v35_v9 = vld [vmem:[#allocation4 + $0x20] sm:$0xff]  ;;  %s71_s2 = sshll.u32 %s127_s0, 4  ;;  %s72_s2 = int_to_ptr.vmem [resolvable:$true] %s71_s2 }
   0xf   :  { %v42_v7 = vmul.f32 %v39_v0, %v33_v4  ;;  %v36_v10 = vld [vmem:[#allocation4 + $0x28] sm:$0xff]  ;;  %v43_v11 = vmul.f32 %v39_v0, %v34_v8  ;;  %v44_v12 = vmul.f32 %v39_v0, %v35_v9  ;;  %v37_v14 = vld [vmem:[#allocation4 + $0x30] sm:$0xff]  ;;  %v38_v15 = vld [vmem:[#allocation4 + $0x38] sm:$0xff]  ;;  %s102_s1 = scalar_lea.vmem %s72_s2, 1024  ;;  %p107_p6 = scmp.lt.s32.totalorder %s72_s2, %s72_s2 }
  0x10   :  { %v45_v13 = vmul.f32 %v39_v0, %v36_v10  ;;  %v49_v16 = vadd.f32 %v48_v2, %v40_v5  ;;  %v50_v17 = vadd.f32 %v48_v2, %v41_v6  ;;  %v46_v19 = vmul.f32 %v39_v0, %v37_v14  ;;  %p103_p5 = scmp.ne.s32.totalorder %s72_s2, %s102_s1  ;;  %p108_p7 = scmp.lt.s32.totalorder %s102_s1, %s102_s1 }
  0x11   :  { %v51_v18 = vadd.f32 %v48_v2, %v42_v7  ;;  %v52_v20 = vadd.f32 %v48_v2, %v43_v11  ;;  %v53_v21 = vadd.f32 %v48_v2, %v44_v12  ;;  %v47_v23 = vmul.f32 %v39_v0, %v38_v15 }
  0x12   :  { %v54_v22 = vadd.f32 %v48_v2, %v45_v13  ;;  %57 = vst [vmem:[#allocation7] sm:$0xff] %v49_v16  ;;  %58 = vst [vmem:[#allocation7 + $0x8] sm:$0xff] %v50_v17  ;;  %v55_v24 = vadd.f32 %v48_v2, %v46_v19  ;;  %p109_p8 = por %p108_p7, %p107_p6 }
  0x13   :  { %59 = vst [vmem:[#allocation7 + $0x10] sm:$0xff] %v51_v18  ;;  %60 = vst [vmem:[#allocation7 + $0x18] sm:$0xff] %v52_v20  ;;  %v56_v25 = vadd.f32 %v48_v2, %v47_v23 }
  0x14   :  { %61 = vst [vmem:[#allocation7 + $0x20] sm:$0xff] %v53_v21  ;;  %62 = vst [vmem:[#allocation7 + $0x28] sm:$0xff] %v54_v22  ;;  %p110_p9 = pnand %p109_p8, %p103_p5 }
  0x15   :  { %63 = vst [vmem:[#allocation7 + $0x30] sm:$0xff] %v55_v24  ;;  %64 = vst [vmem:[#allocation7 + $0x38] sm:$0xff] %v56_v25 }
  0x16   :  { %113 = shalt.err (!%p110_p9)
}
  0x17   :  { %74 = dma.vmem_to_hbm [thread:$0]  %s72_s2, 1024, %s163_s3, [#allocation6]  }
  0x18   :  { %124 = dma.done.wait [#allocation6], 1024  }
  0x19   :  { %125 = vsyncadd [#allocation6], 4294966272 }
  0x1a   :  { %78 = vsyncpa [#allocation5], 1 }
  0x1b   :  { %79 = vsyncpa [#allocation6], 1 }

</bundles_post_ra>
